<compile_context>
chip_gen: v5e
topology: v5e:2x2
jax: 0.10.0
libtpu: 0.0.40
codegen_flags: <defaults>
</compile_context>

<pallas_src>
import functools

import jax
import jax.numpy as jnp
from jax.experimental import pallas as pl
from jax.experimental.pallas import tpu as pltpu


def _gat_kernel(x_src_ref, x_dst_ref, w_ref, asrc_ref, adst_ref, bias_ref,
                adj_ref, out_ref, *, num_heads, out_channels, num_tiles):
    h_n, c = num_heads, out_channels
    x_src = x_src_ref[...].astype(jnp.float32)        # [N, F]   all nodes (sources)
    x_dst = x_dst_ref[...].astype(jnp.float32)        # [bn, F]  destination row tile
    w = w_ref[...].astype(jnp.float32)                # [F, H*C]
    neigh = adj_ref[...].astype(jnp.float32) > 0.0    # [bn, N]  True iff edge j -> i

    # Shared linear projection (GATConv uses the same lin for src and dst).
    xp_src = jnp.dot(x_src, w, preferred_element_type=jnp.float32)       # [N, H*C]
    if num_tiles == 1:
        xp_dst = xp_src                    # single tile: dst rows == src rows
    else:
        xp_dst = jnp.dot(x_dst, w, preferred_element_type=jnp.float32)   # [bn, H*C]

    # All-head attention logits with block-diagonal att maps (one MXU call per
    # side) + a single [N, Hp] -> [Hp, N] transpose (instead of H x `xh.T`).
    a_src = jnp.dot(xp_src, asrc_ref[...], preferred_element_type=jnp.float32)  # [N, Hp]
    a_dst = jnp.dot(xp_dst, adst_ref[...], preferred_element_type=jnp.float32)  # [bn, Hp]
    a_src_t = a_src.T                                                            # [Hp, N]

    # Per-head masked softmax (tiny VPU work); heads collected for one fused
    # aggregation matmul afterwards.
    neg_big = jnp.float32(-1e30)
    p_heads = []
    for h in range(h_n):                      # heads are few & static -> unrolled
        e = a_dst[:, h:h + 1] + a_src_t[h:h + 1, :]        # [bn, N]
        e = jnp.where(e > 0, e, 0.2 * e)                   # LeakyReLU(0.2)
        e = jnp.where(neigh, e, neg_big)                   # mask non-edges
        e = e - jnp.max(e, axis=-1, keepdims=True)
        p = jnp.exp(e)
        p = p * pl.reciprocal(jnp.sum(p, axis=-1, keepdims=True), approx=True)
        p_heads.append(p)

    # Fused aggregation: acc = P @ Xh, one [bn, H*N] x [H*N, C] MXU matmul.
    p_cat = jnp.concatenate(p_heads, axis=-1)                              # [bn, H*N]
    xh_cat = jnp.concatenate(
        [xp_src[:, h * c:(h + 1) * c] for h in range(h_n)], axis=0)        # [H*N, C]
    acc = jnp.dot(p_cat, xh_cat, preferred_element_type=jnp.float32)       # [bn, C]

    # concat=False -> mean over heads; + bias; residual connection.
    out = acc * jnp.float32(1.0 / h_n) + bias_ref[...]
    out_ref[...] = (x_dst + out).astype(out_ref.dtype)


def _block_diag_att(att, num_heads, out_channels, pad_heads):
    """[H, C] per-head att vector -> block-diagonal [H*C, pad_heads] map so that
    (xp @ map)[:, h] == sum_c xp[:, h*C + c] * att[h, c]."""
    idx = jnp.arange(num_heads * out_channels)
    a = jnp.zeros((num_heads * out_channels, pad_heads), att.dtype)
    return a.at[idx, idx // out_channels].set(att.reshape(-1))


def improved_gat_layer(features, adj_mask, params, num_heads):
    n, f = features.shape
    hc = params["w"].shape[1]
    c = hc // num_heads
    assert c * num_heads == hc and c == f, "residual requires out_channels == in_channels"

    # Destination-row tiling: bounds adjacency VMEM for big graphs; "parallel"
    # lets Mosaic shard tiles across v7x's 2 TensorCores.  At N=16 it is 1 tile.
    block_n = n if n <= 128 else 128
    num_tiles = pl.cdiv(n, block_n)

    # Pad the head axis to a sublane multiple so the single logit transpose is
    # tile-aligned (padding columns are zero and never read back).
    hpad = ((num_heads + 7) // 8) * 8
    asrc = _block_diag_att(params["att_src"], num_heads, c, hpad)   # [H*C, Hp]
    adst = _block_diag_att(params["att_dst"], num_heads, c, hpad)   # [H*C, Hp]

    kernel = functools.partial(_gat_kernel, num_heads=num_heads,
                               out_channels=c, num_tiles=num_tiles)
    return pl.pallas_call(
        kernel,
        out_shape=jax.ShapeDtypeStruct((n, f), features.dtype),
        grid=(num_tiles,),
        in_specs=[
            pl.BlockSpec((n, f), lambda i: (0, 0)),           # x: all nodes (sources)
            pl.BlockSpec((block_n, f), lambda i: (i, 0)),     # x: destination tile
            pl.BlockSpec((f, hc), lambda i: (0, 0)),          # W
            pl.BlockSpec((hc, hpad), lambda i: (0, 0)),       # att_src block-diag map
            pl.BlockSpec((hc, hpad), lambda i: (0, 0)),       # att_dst block-diag map
            pl.BlockSpec((1, f), lambda i: (0, 0)),           # bias
            pl.BlockSpec((block_n, n), lambda i: (i, 0)),     # int8 adjacency rows
        ],
        out_specs=pl.BlockSpec((block_n, f), lambda i: (i, 0)),
        compiler_params=pltpu.CompilerParams(
            dimension_semantics=("parallel",)),
    )(features, features, params["w"], asrc, adst, params["bias"], adj_mask)


def edge_index_to_mask(edge_index, n):
    """Dense int8 adjacency mask with self loops: mask[dst, src] = 1."""
    src, dst = edge_index[0], edge_index[1]
    mask = jnp.zeros((n, n), jnp.int8).at[dst, src].set(1)
    diag = jnp.arange(n)
    return mask.at[diag, diag].set(1)          # add_self_loops=True


if __name__ == "__main__":
    N, HIDE, HEADS, E = 16, 32, 5, 40

    key = jax.random.PRNGKey(0)
    kx, ksrc, kdst, kw, kas, kad = jax.random.split(key, 6)

    features = jax.random.normal(kx, (N, HIDE), jnp.float32)
    edge_index = jnp.stack([
        jax.random.randint(ksrc, (E,), 0, N),
        jax.random.randint(kdst, (E,), 0, N),
    ])                                                          # [2, E]
    adj_mask = edge_index_to_mask(edge_index, N)

    params = {
        "w":       0.1 * jax.random.normal(kw,  (HIDE, HEADS * HIDE), jnp.float32),
        "att_src": 0.1 * jax.random.normal(kas, (HEADS, HIDE), jnp.float32),
        "att_dst": 0.1 * jax.random.normal(kad, (HEADS, HIDE), jnp.float32),
        "bias":    jnp.zeros((1, HIDE), jnp.float32),
    }
    # TODO(synk): module-level dropout arg is never applied in the forward pass
    # (GATConv's internal attention dropout defaults to 0.0), so no dropout here.
    # TODO(synk): for large sparse graphs replace the dense mask with CSR +
    # PrefetchScalarGridSpec (O(E) work) as suggested in the perf review.

    out = improved_gat_layer(features, adj_mask, params, HEADS)
    jax.block_until_ready(out)
    assert out.shape == (N, HIDE) and bool(jnp.all(jnp.isfinite(out)))
    print("KERNEL_OK")
</pallas_src>

<mosaic_0001>
module attributes {stable_mosaic.version = 11 : i64} {
  func.func @_gat_kernel(%arg0: i32, %arg1: memref<16x32xf32, #tpu.memory_space<vmem>>, %arg2: memref<16x32xf32, #tpu.memory_space<vmem>>, %arg3: memref<32x160xf32, #tpu.memory_space<vmem>>, %arg4: memref<160x8xf32, #tpu.memory_space<vmem>>, %arg5: memref<160x8xf32, #tpu.memory_space<vmem>>, %arg6: memref<1x32xf32, #tpu.memory_space<vmem>>, %arg7: memref<16x16xi8, #tpu.memory_space<vmem>>, %arg8: memref<16x32xf32, #tpu.memory_space<vmem>>) attributes {dimension_semantics = [#tpu.dimension_semantics<parallel>], iteration_bounds = array<i64: 1>, scalar_prefetch = 0 : i64, scratch_operands = 0 : i64, tpu.core_type = #tpu.core_type<tc>, window_params = [{pipeline_mode = #tpu.pipeline_mode<synchronous>, transform_indices = @transform_0, window_bounds = array<i64: 16, 32>}, {transform_indices = @transform_1, window_bounds = array<i64: 16, 32>}, {pipeline_mode = #tpu.pipeline_mode<synchronous>, transform_indices = @transform_2, window_bounds = array<i64: 32, 160>}, {pipeline_mode = #tpu.pipeline_mode<synchronous>, transform_indices = @transform_3, window_bounds = array<i64: 160, 8>}, {pipeline_mode = #tpu.pipeline_mode<synchronous>, transform_indices = @transform_4, window_bounds = array<i64: 160, 8>}, {pipeline_mode = #tpu.pipeline_mode<synchronous>, transform_indices = @transform_5, window_bounds = array<i64: 1, 32>}, {transform_indices = @transform_6, window_bounds = array<i64: 16, 16>}, {transform_indices = @transform_7, window_bounds = array<i64: 16, 32>}]} {
    %c0 = arith.constant 0 : index
    %c0_0 = arith.constant 0 : index
    %0 = vector.load %arg1[%c0, %c0_0] : memref<16x32xf32, #tpu.memory_space<vmem>>, vector<16x32xf32>
    %c0_1 = arith.constant 0 : index
    %c0_2 = arith.constant 0 : index
    %1 = vector.load %arg2[%c0_1, %c0_2] : memref<16x32xf32, #tpu.memory_space<vmem>>, vector<16x32xf32>
    %c0_3 = arith.constant 0 : index
    %c0_4 = arith.constant 0 : index
    %2 = vector.load %arg3[%c0_3, %c0_4] : memref<32x160xf32, #tpu.memory_space<vmem>>, vector<32x160xf32>
    %c0_5 = arith.constant 0 : index
    %c0_6 = arith.constant 0 : index
    %3 = vector.load %arg7[%c0_5, %c0_6] : memref<16x16xi8, #tpu.memory_space<vmem>>, vector<16x16xi8>
    %4 = arith.sitofp %3 : vector<16x16xi8> to vector<16x16xf32>
    %cst = arith.constant 0.000000e+00 : f32
    %5 = vector.broadcast %cst : f32 to vector<16x16xf32>
    %6 = arith.cmpf ogt, %4, %5 : vector<16x16xf32>
    %cst_7 = arith.constant dense<0.000000e+00> : vector<16x160xf32>
    %7 = tpu.matmul %0, %2, %cst_7 {dimension_numbers = #tpu.dot_dimension_numbers<[1], [0], [0], [1], [0, 0, 1, 1], [], []>} : vector<16x32xf32>, vector<32x160xf32>, vector<16x160xf32> -> vector<16x160xf32>
    %c0_8 = arith.constant 0 : index
    %c0_9 = arith.constant 0 : index
    %8 = vector.load %arg4[%c0_8, %c0_9] : memref<160x8xf32, #tpu.memory_space<vmem>>, vector<160x8xf32>
    %cst_10 = arith.constant dense<0.000000e+00> : vector<16x8xf32>
    %9 = tpu.matmul %7, %8, %cst_10 {dimension_numbers = #tpu.dot_dimension_numbers<[1], [0], [0], [1], [0, 0, 1, 1], [], []>} : vector<16x160xf32>, vector<160x8xf32>, vector<16x8xf32> -> vector<16x8xf32>
    %c0_11 = arith.constant 0 : index
    %c0_12 = arith.constant 0 : index
    %10 = vector.load %arg5[%c0_11, %c0_12] : memref<160x8xf32, #tpu.memory_space<vmem>>, vector<160x8xf32>
    %cst_13 = arith.constant dense<0.000000e+00> : vector<16x8xf32>
    %11 = tpu.matmul %7, %10, %cst_13 {dimension_numbers = #tpu.dot_dimension_numbers<[1], [0], [0], [1], [0, 0, 1, 1], [], []>} : vector<16x160xf32>, vector<160x8xf32>, vector<16x8xf32> -> vector<16x8xf32>
    %12 = tpu.transpose %9, [1, 0] : vector<16x8xf32> -> vector<8x16xf32>
    %13 = vector.extract_strided_slice %11 {offsets = [0, 0], sizes = [16, 1], strides = [1, 1]} : vector<16x8xf32> to vector<16x1xf32>
    %14 = vector.extract_strided_slice %12 {offsets = [0, 0], sizes = [1, 16], strides = [1, 1]} : vector<8x16xf32> to vector<1x16xf32>
    %15 = vector.broadcast %13 : vector<16x1xf32> to vector<16x16xf32>
    %16 = vector.broadcast %14 : vector<1x16xf32> to vector<16x16xf32>
    %17 = arith.addf %15, %16 : vector<16x16xf32>
    %cst_14 = arith.constant 0.000000e+00 : f32
    %18 = vector.broadcast %cst_14 : f32 to vector<16x16xf32>
    %19 = arith.cmpf ogt, %17, %18 : vector<16x16xf32>
    %cst_15 = arith.constant 2.000000e-01 : f32
    %20 = vector.broadcast %cst_15 : f32 to vector<16x16xf32>
    %21 = arith.mulf %20, %17 : vector<16x16xf32>
    %22 = arith.select %19, %17, %21 : vector<16x16xi1>, vector<16x16xf32>
    %cst_16 = arith.constant -1.000000e+30 : f32
    %23 = vector.broadcast %cst_16 : f32 to vector<16x16xf32>
    %24 = arith.select %6, %22, %23 : vector<16x16xi1>, vector<16x16xf32>
    %cst_17 = arith.constant dense<0xFF800000> : vector<16xf32>
    %25 = vector.multi_reduction <maximumf>, %24, %cst_17 [1] : vector<16x16xf32> to vector<16xf32>
    %26 = vector.shape_cast %25 : vector<16xf32> to vector<16x1xf32>
    %27 = vector.broadcast %26 : vector<16x1xf32> to vector<16x16xf32>
    %28 = arith.subf %24, %27 : vector<16x16xf32>
    %29 = math.exp %28 : vector<16x16xf32>
    %cst_18 = arith.constant dense<0.000000e+00> : vector<16xf32>
    %30 = vector.multi_reduction <add>, %29, %cst_18 [1] : vector<16x16xf32> to vector<16xf32>
    %31 = vector.shape_cast %30 : vector<16xf32> to vector<16x1xf32>
    %32 = tpu.reciprocal %31 {approx = true} : vector<16x1xf32> -> vector<16x1xf32>
    %33 = vector.broadcast %32 : vector<16x1xf32> to vector<16x16xf32>
    %34 = arith.mulf %29, %33 : vector<16x16xf32>
    %35 = vector.extract_strided_slice %11 {offsets = [0, 1], sizes = [16, 1], strides = [1, 1]} : vector<16x8xf32> to vector<16x1xf32>
    %36 = vector.extract_strided_slice %12 {offsets = [1, 0], sizes = [1, 16], strides = [1, 1]} : vector<8x16xf32> to vector<1x16xf32>
    %37 = vector.broadcast %35 : vector<16x1xf32> to vector<16x16xf32>
    %38 = vector.broadcast %36 : vector<1x16xf32> to vector<16x16xf32>
    %39 = arith.addf %37, %38 : vector<16x16xf32>
    %cst_19 = arith.constant 0.000000e+00 : f32
    %40 = vector.broadcast %cst_19 : f32 to vector<16x16xf32>
    %41 = arith.cmpf ogt, %39, %40 : vector<16x16xf32>
    %cst_20 = arith.constant 2.000000e-01 : f32
    %42 = vector.broadcast %cst_20 : f32 to vector<16x16xf32>
    %43 = arith.mulf %42, %39 : vector<16x16xf32>
    %44 = arith.select %41, %39, %43 : vector<16x16xi1>, vector<16x16xf32>
    %cst_21 = arith.constant -1.000000e+30 : f32
    %45 = vector.broadcast %cst_21 : f32 to vector<16x16xf32>
    %46 = arith.select %6, %44, %45 : vector<16x16xi1>, vector<16x16xf32>
    %cst_22 = arith.constant dense<0xFF800000> : vector<16xf32>
    %47 = vector.multi_reduction <maximumf>, %46, %cst_22 [1] : vector<16x16xf32> to vector<16xf32>
    %48 = vector.shape_cast %47 : vector<16xf32> to vector<16x1xf32>
    %49 = vector.broadcast %48 : vector<16x1xf32> to vector<16x16xf32>
    %50 = arith.subf %46, %49 : vector<16x16xf32>
    %51 = math.exp %50 : vector<16x16xf32>
    %cst_23 = arith.constant dense<0.000000e+00> : vector<16xf32>
    %52 = vector.multi_reduction <add>, %51, %cst_23 [1] : vector<16x16xf32> to vector<16xf32>
    %53 = vector.shape_cast %52 : vector<16xf32> to vector<16x1xf32>
    %54 = tpu.reciprocal %53 {approx = true} : vector<16x1xf32> -> vector<16x1xf32>
    %55 = vector.broadcast %54 : vector<16x1xf32> to vector<16x16xf32>
    %56 = arith.mulf %51, %55 : vector<16x16xf32>
    %57 = vector.extract_strided_slice %11 {offsets = [0, 2], sizes = [16, 1], strides = [1, 1]} : vector<16x8xf32> to vector<16x1xf32>
    %58 = vector.extract_strided_slice %12 {offsets = [2, 0], sizes = [1, 16], strides = [1, 1]} : vector<8x16xf32> to vector<1x16xf32>
    %59 = vector.broadcast %57 : vector<16x1xf32> to vector<16x16xf32>
    %60 = vector.broadcast %58 : vector<1x16xf32> to vector<16x16xf32>
    %61 = arith.addf %59, %60 : vector<16x16xf32>
    %cst_24 = arith.constant 0.000000e+00 : f32
    %62 = vector.broadcast %cst_24 : f32 to vector<16x16xf32>
    %63 = arith.cmpf ogt, %61, %62 : vector<16x16xf32>
    %cst_25 = arith.constant 2.000000e-01 : f32
    %64 = vector.broadcast %cst_25 : f32 to vector<16x16xf32>
    %65 = arith.mulf %64, %61 : vector<16x16xf32>
    %66 = arith.select %63, %61, %65 : vector<16x16xi1>, vector<16x16xf32>
    %cst_26 = arith.constant -1.000000e+30 : f32
    %67 = vector.broadcast %cst_26 : f32 to vector<16x16xf32>
    %68 = arith.select %6, %66, %67 : vector<16x16xi1>, vector<16x16xf32>
    %cst_27 = arith.constant dense<0xFF800000> : vector<16xf32>
    %69 = vector.multi_reduction <maximumf>, %68, %cst_27 [1] : vector<16x16xf32> to vector<16xf32>
    %70 = vector.shape_cast %69 : vector<16xf32> to vector<16x1xf32>
    %71 = vector.broadcast %70 : vector<16x1xf32> to vector<16x16xf32>
    %72 = arith.subf %68, %71 : vector<16x16xf32>
    %73 = math.exp %72 : vector<16x16xf32>
    %cst_28 = arith.constant dense<0.000000e+00> : vector<16xf32>
    %74 = vector.multi_reduction <add>, %73, %cst_28 [1] : vector<16x16xf32> to vector<16xf32>
    %75 = vector.shape_cast %74 : vector<16xf32> to vector<16x1xf32>
    %76 = tpu.reciprocal %75 {approx = true} : vector<16x1xf32> -> vector<16x1xf32>
    %77 = vector.broadcast %76 : vector<16x1xf32> to vector<16x16xf32>
    %78 = arith.mulf %73, %77 : vector<16x16xf32>
    %79 = vector.extract_strided_slice %11 {offsets = [0, 3], sizes = [16, 1], strides = [1, 1]} : vector<16x8xf32> to vector<16x1xf32>
    %80 = vector.extract_strided_slice %12 {offsets = [3, 0], sizes = [1, 16], strides = [1, 1]} : vector<8x16xf32> to vector<1x16xf32>
    %81 = vector.broadcast %79 : vector<16x1xf32> to vector<16x16xf32>
    %82 = vector.broadcast %80 : vector<1x16xf32> to vector<16x16xf32>
    %83 = arith.addf %81, %82 : vector<16x16xf32>
    %cst_29 = arith.constant 0.000000e+00 : f32
    %84 = vector.broadcast %cst_29 : f32 to vector<16x16xf32>
    %85 = arith.cmpf ogt, %83, %84 : vector<16x16xf32>
    %cst_30 = arith.constant 2.000000e-01 : f32
    %86 = vector.broadcast %cst_30 : f32 to vector<16x16xf32>
    %87 = arith.mulf %86, %83 : vector<16x16xf32>
    %88 = arith.select %85, %83, %87 : vector<16x16xi1>, vector<16x16xf32>
    %cst_31 = arith.constant -1.000000e+30 : f32
    %89 = vector.broadcast %cst_31 : f32 to vector<16x16xf32>
    %90 = arith.select %6, %88, %89 : vector<16x16xi1>, vector<16x16xf32>
    %cst_32 = arith.constant dense<0xFF800000> : vector<16xf32>
    %91 = vector.multi_reduction <maximumf>, %90, %cst_32 [1] : vector<16x16xf32> to vector<16xf32>
    %92 = vector.shape_cast %91 : vector<16xf32> to vector<16x1xf32>
    %93 = vector.broadcast %92 : vector<16x1xf32> to vector<16x16xf32>
    %94 = arith.subf %90, %93 : vector<16x16xf32>
    %95 = math.exp %94 : vector<16x16xf32>
    %cst_33 = arith.constant dense<0.000000e+00> : vector<16xf32>
    %96 = vector.multi_reduction <add>, %95, %cst_33 [1] : vector<16x16xf32> to vector<16xf32>
    %97 = vector.shape_cast %96 : vector<16xf32> to vector<16x1xf32>
    %98 = tpu.reciprocal %97 {approx = true} : vector<16x1xf32> -> vector<16x1xf32>
    %99 = vector.broadcast %98 : vector<16x1xf32> to vector<16x16xf32>
    %100 = arith.mulf %95, %99 : vector<16x16xf32>
    %101 = vector.extract_strided_slice %11 {offsets = [0, 4], sizes = [16, 1], strides = [1, 1]} : vector<16x8xf32> to vector<16x1xf32>
    %102 = vector.extract_strided_slice %12 {offsets = [4, 0], sizes = [1, 16], strides = [1, 1]} : vector<8x16xf32> to vector<1x16xf32>
    %103 = vector.broadcast %101 : vector<16x1xf32> to vector<16x16xf32>
    %104 = vector.broadcast %102 : vector<1x16xf32> to vector<16x16xf32>
    %105 = arith.addf %103, %104 : vector<16x16xf32>
    %cst_34 = arith.constant 0.000000e+00 : f32
    %106 = vector.broadcast %cst_34 : f32 to vector<16x16xf32>
    %107 = arith.cmpf ogt, %105, %106 : vector<16x16xf32>
    %cst_35 = arith.constant 2.000000e-01 : f32
    %108 = vector.broadcast %cst_35 : f32 to vector<16x16xf32>
    %109 = arith.mulf %108, %105 : vector<16x16xf32>
    %110 = arith.select %107, %105, %109 : vector<16x16xi1>, vector<16x16xf32>
    %cst_36 = arith.constant -1.000000e+30 : f32
    %111 = vector.broadcast %cst_36 : f32 to vector<16x16xf32>
    %112 = arith.select %6, %110, %111 : vector<16x16xi1>, vector<16x16xf32>
    %cst_37 = arith.constant dense<0xFF800000> : vector<16xf32>
    %113 = vector.multi_reduction <maximumf>, %112, %cst_37 [1] : vector<16x16xf32> to vector<16xf32>
    %114 = vector.shape_cast %113 : vector<16xf32> to vector<16x1xf32>
    %115 = vector.broadcast %114 : vector<16x1xf32> to vector<16x16xf32>
    %116 = arith.subf %112, %115 : vector<16x16xf32>
    %117 = math.exp %116 : vector<16x16xf32>
    %cst_38 = arith.constant dense<0.000000e+00> : vector<16xf32>
    %118 = vector.multi_reduction <add>, %117, %cst_38 [1] : vector<16x16xf32> to vector<16xf32>
    %119 = vector.shape_cast %118 : vector<16xf32> to vector<16x1xf32>
    %120 = tpu.reciprocal %119 {approx = true} : vector<16x1xf32> -> vector<16x1xf32>
    %121 = vector.broadcast %120 : vector<16x1xf32> to vector<16x16xf32>
    %122 = arith.mulf %117, %121 : vector<16x16xf32>
    %123 = tpu.concatenate %34, %56, %78, %100, %122 in 1 : vector<16x16xf32>, vector<16x16xf32>, vector<16x16xf32>, vector<16x16xf32>, vector<16x16xf32> -> vector<16x80xf32>
    %124 = vector.extract_strided_slice %7 {offsets = [0, 0], sizes = [16, 32], strides = [1, 1]} : vector<16x160xf32> to vector<16x32xf32>
    %125 = vector.extract_strided_slice %7 {offsets = [0, 32], sizes = [16, 32], strides = [1, 1]} : vector<16x160xf32> to vector<16x32xf32>
    %126 = vector.extract_strided_slice %7 {offsets = [0, 64], sizes = [16, 32], strides = [1, 1]} : vector<16x160xf32> to vector<16x32xf32>
    %127 = vector.extract_strided_slice %7 {offsets = [0, 96], sizes = [16, 32], strides = [1, 1]} : vector<16x160xf32> to vector<16x32xf32>
    %128 = vector.extract_strided_slice %7 {offsets = [0, 128], sizes = [16, 32], strides = [1, 1]} : vector<16x160xf32> to vector<16x32xf32>
    %129 = tpu.concatenate %124, %125, %126, %127, %128 in 0 : vector<16x32xf32>, vector<16x32xf32>, vector<16x32xf32>, vector<16x32xf32>, vector<16x32xf32> -> vector<80x32xf32>
    %cst_39 = arith.constant dense<0.000000e+00> : vector<16x32xf32>
    %130 = tpu.matmul %123, %129, %cst_39 {dimension_numbers = #tpu.dot_dimension_numbers<[1], [0], [0], [1], [0, 0, 1, 1], [], []>} : vector<16x80xf32>, vector<80x32xf32>, vector<16x32xf32> -> vector<16x32xf32>
    %cst_40 = arith.constant 2.000000e-01 : f32
    %131 = vector.broadcast %cst_40 : f32 to vector<16x32xf32>
    %132 = arith.mulf %130, %131 : vector<16x32xf32>
    %c0_41 = arith.constant 0 : index
    %c0_42 = arith.constant 0 : index
    %133 = vector.load %arg6[%c0_41, %c0_42] : memref<1x32xf32, #tpu.memory_space<vmem>>, vector<1x32xf32>
    %134 = vector.broadcast %133 : vector<1x32xf32> to vector<16x32xf32>
    %135 = arith.addf %132, %134 : vector<16x32xf32>
    %136 = arith.addf %1, %135 : vector<16x32xf32>
    %c0_43 = arith.constant 0 : index
    %c0_44 = arith.constant 0 : index
    %137 = vector.load %arg8[%c0_43, %c0_44] : memref<16x32xf32, #tpu.memory_space<vmem>>, vector<16x32xf32>
    tpu.vector_store %arg8[%c0_43, %c0_44], %136 {strides = array<i32>} : memref<16x32xf32, #tpu.memory_space<vmem>>, vector<16x32xf32>,
    return
  }
  func.func @transform_0(%arg0: i32) -> (i32, i32) {
    %c0_i32 = arith.constant 0 : i32
    %c0_i32_0 = arith.constant 0 : i32
    %c0_i32_1 = arith.constant 0 : i32
    return %c0_i32, %c0_i32_0 : i32, i32
  }
  func.func @transform_1(%arg0: i32) -> (i32, i32) {
    %c0_i32 = arith.constant 0 : i32
    %c0_i32_0 = arith.constant 0 : i32
    return %arg0, %c0_i32 : i32, i32
  }
  func.func @transform_2(%arg0: i32) -> (i32, i32) {
    %c0_i32 = arith.constant 0 : i32
    %c0_i32_0 = arith.constant 0 : i32
    %c0_i32_1 = arith.constant 0 : i32
    return %c0_i32, %c0_i32_0 : i32, i32
  }
  func.func @transform_3(%arg0: i32) -> (i32, i32) {
    %c0_i32 = arith.constant 0 : i32
    %c0_i32_0 = arith.constant 0 : i32
    %c0_i32_1 = arith.constant 0 : i32
    return %c0_i32, %c0_i32_0 : i32, i32
  }
  func.func @transform_4(%arg0: i32) -> (i32, i32) {
    %c0_i32 = arith.constant 0 : i32
    %c0_i32_0 = arith.constant 0 : i32
    %c0_i32_1 = arith.constant 0 : i32
    return %c0_i32, %c0_i32_0 : i32, i32
  }
  func.func @transform_5(%arg0: i32) -> (i32, i32) {
    %c0_i32 = arith.constant 0 : i32
    %c0_i32_0 = arith.constant 0 : i32
    %c0_i32_1 = arith.constant 0 : i32
    return %c0_i32, %c0_i32_0 : i32, i32
  }
  func.func @transform_6(%arg0: i32) -> (i32, i32) {
    %c0_i32 = arith.constant 0 : i32
    %c0_i32_0 = arith.constant 0 : i32
    return %arg0, %c0_i32 : i32, i32
  }
  func.func @transform_7(%arg0: i32) -> (i32, i32) {
    %c0_i32 = arith.constant 0 : i32
    %c0_i32_0 = arith.constant 0 : i32
    return %arg0, %c0_i32 : i32, i32
  }
}

</mosaic_0001>

<bundles_post_ra>
// kernel: tpu_custom_call.1
= control target key start
LH: loop header
LB: loop body
LE: loop exit
PB: predicated region body
PF: predicated region fallthrough
CT: control target
= control target key end

     0   :  { %vm47_vm0 = vcmask 261120   ;;  %s1093_s0 = inlined_call_operand.vmem [shape: f32[16,32], index: 0, kind: input, shape index: {}]   ;;  %s1094_s1 = inlined_call_operand.vmem [shape: f32[16,32], index: 1, kind: input, shape index: {}]   ;;  %s1095_s2 = inlined_call_operand.vmem [shape: f32[32,160], index: 2, kind: input, shape index: {}]   ;;  %s1096_s3 = inlined_call_operand.vmem [shape: f32[160,8], index: 3, kind: input, shape index: {}]   ;;  %s1097_s4 = inlined_call_operand.vmem [shape: f32[160,8], index: 4, kind: input, shape index: {}]   ;;  %s1098_s5 = inlined_call_operand.vmem [shape: f32[1,32], index: 5, kind: input, shape index: {}]   ;;  %s1099_s6 = inlined_call_operand.vmem [shape: s8[16,16], index: 6, kind: input, shape index: {}]   ;;  %s1100_s7 = inlined_call_operand.hbm [shape: f32[16,32], index: 7, kind: output, shape index: {}]  }
   0x1   :  { %v37_v0 = vld [vmem:[%s1095_s2 + $0x30] sm:$0xff]  ;;  %v38_v1 = vld [vmem:[%s1095_s2 + $0x38] sm:$0xff]  ;;  %v35_v2 = vld [vmem:[%s1095_s2 + $0x20] sm:$0xff] }
   0x2   :  { %66 = vmatpush.msra.mxu0 %v37_v0  ;;  %89 = vmatpush.msra.mxu1 %v38_v1  ;;  %v36_v3 = vld [vmem:[%s1095_s2 + $0x28] sm:$0xff]  ;;  %v33_v4 = vld [vmem:[%s1095_s2 + $0x10] sm:$0xff]  ;;  %v34_v5 = vld [vmem:[%s1095_s2 + $0x18] sm:$0xff] }
   0x3   :  { %v115_v6 = vld [vmem:[%s1096_s3 + $0x78] sm:$0xff]  ;;  %v31_v7 = vld [vmem:[%s1095_s2] sm:$0xff]  ;;  %v32_v8 = vld [vmem:[%s1095_s2 + $0x8] sm:$0xff] }
   0x4   :  { %67 = vmatpush.msra.mxu0 %v35_v2  ;;  %90 = vmatpush.msra.mxu1 %v36_v3  ;;  %v114_v9 = vld [vmem:[%s1096_s3 + $0x70] sm:$0xff]  ;;  %v27_v10 = vld [vmem:[%s1093_s0] sm:$0xff]  ;;  %v187_v11 = vld [vmem:[%s1097_s4 + $0x78] sm:$0xff] }
   0x5   :  { %126 = vmatpush.msra.mxu2 %v115_v6  ;;  %v113_v12 = vld [vmem:[%s1096_s3 + $0x68] sm:$0xff]  ;;  %v186_v13 = vld [vmem:[%s1097_s4 + $0x70] sm:$0xff]  ;;  %v112_v14 = vld [vmem:[%s1096_s3 + $0x60] sm:$0xff] }
   0x6   :  { %68 = vmatpush.msra.mxu0 %v33_v4  ;;  %91 = vmatpush.msra.mxu1 %v34_v5  ;;  %v191_v15 = vld [vmem:[%s1097_s4 + $0x98] sm:$0xff]  ;;  %v185_v16 = vld [vmem:[%s1097_s4 + $0x68] sm:$0xff]  ;;  %v190_v18 = vld [vmem:[%s1097_s4 + $0x90] sm:$0xff] }
   0x7   :  { %127 = vmatpush.msra.mxu2 %v114_v9  ;;  %v111_v17 = vld [vmem:[%s1096_s3 + $0x58] sm:$0xff]  ;;  %v184_v19 = vld [vmem:[%s1097_s4 + $0x60] sm:$0xff]  ;;  %v110_v20 = vld [vmem:[%s1096_s3 + $0x50] sm:$0xff] }
   0x8   :  { %69 = vmatpush.msra.mxu0 %v31_v7  ;;  %92 = vmatpush.msra.mxu1 %v32_v8  ;;  %v189_v21 = vld [vmem:[%s1097_s4 + $0x88] sm:$0xff]  ;;  %v119_v22 = vld [vmem:[%s1096_s3 + $0x98] sm:$0xff]  ;;  %v118_v26 = vld [vmem:[%s1096_s3 + $0x90] sm:$0xff] }
   0x9   :  { %600 = vmatmul.msk.f32.vlgmr.msra.gmra.mxu0 %vm47_vm0, %v27_v10  ;;  %602 = vmatmul.msk.f32.vlgmr.msra.gmra.mxu1 %vm47_vm0, %v27_v10  ;;  %v28_v23 = vld [vmem:[%s1093_s0 + $0x8] sm:$0xff]  ;;  %v183_v24 = vld [vmem:[%s1097_s4 + $0x58] sm:$0xff]  ;;  %v188_v27 = vld [vmem:[%s1097_s4 + $0x80] sm:$0xff] }
   0xa   :  { %192 = vmatpush.msrb.mxu0 %v187_v11  ;;  %128 = vmatpush.msra.mxu2 %v113_v12  ;;  %v109_v25 = vld [vmem:[%s1096_s3 + $0x48] sm:$0xff]  ;;  %v182_v28 = vld [vmem:[%s1097_s4 + $0x50] sm:$0xff]  ;;  %v108_v29 = vld [vmem:[%s1096_s3 + $0x40] sm:$0xff] }
   0xb   :  { %227 = vmatpush.msrb.mxu1 %v191_v15  ;;  %161 = vmatpush.msra.mxu3 %v119_v22 }
   0xc   :  { %193 = vmatpush.msrb.mxu0 %v186_v13  ;;  %129 = vmatpush.msra.mxu2 %v112_v14 }
   0xd   :  { %228 = vmatpush.msrb.mxu1 %v190_v18 }
   0xe   :  { %194 = vmatpush.msrb.mxu0 %v185_v16  ;;  %130 = vmatpush.msra.mxu2 %v111_v17 }
   0xf   :  { %229 = vmatpush.msrb.mxu1 %v189_v21 }
  0x10   :  { %195 = vmatpush.msrb.mxu0 %v184_v19  ;;  %131 = vmatpush.msra.mxu2 %v110_v20 }
  0x11   :  { %601 = vmatmul.msk.f32.gmra.mxu0 %vm47_vm0, %v28_v23  ;;  %603 = vmatmul.msk.f32.gmra.mxu1 %vm47_vm0, %v28_v23 }
  0x12   :  { %12 = vsyncpa [#allocation3], 0  ;;  %196 = vmatpush.msrb.mxu0 %v183_v24  ;;  %132 = vmatpush.msra.mxu2 %v109_v25  ;;  %v117_v30 = vld [vmem:[%s1096_s3 + $0x88] sm:$0xff]  ;;  %v107_v32 = vld [vmem:[%s1096_s3 + $0x38] sm:$0xff]  ;;  %v721_v54 = vmov 3   ;;  %v722_v55 = vmov 1  }
  0x13   :  { %v181_v31 = vld [vmem:[%s1097_s4 + $0x48] sm:$0xff]  ;;  %162 = vmatpush.msra.mxu3 %v118_v26  ;;  %230 = vmatpush.msrb.mxu1 %v188_v27  ;;  %v180_v33 = vld [vmem:[%s1097_s4 + $0x40] sm:$0xff]  ;;  %v106_v34 = vld [vmem:[%s1096_s3 + $0x30] sm:$0xff]  ;;  %v723_v62 = vmov 4   ;;  %v724_v63 = vmov 2   ;;  %v725_v0 = vmov 0  }
  0x14   :  { %197 = vmatpush.msrb.mxu0 %v182_v28  ;;  %133 = vmatpush.msra.mxu2 %v108_v29  ;;  %v179_v35 = vld [vmem:[%s1097_s4 + $0x38] sm:$0xff]  ;;  %v105_v36 = vld [vmem:[%s1096_s3 + $0x28] sm:$0xff]  ;;  %v178_v37 = vld [vmem:[%s1097_s4 + $0x30] sm:$0xff]  ;;  %vm291_vm2 = vcmask 130048   ;;  %s727_s2 = smov 64   ;;  %s728_s27 = smov 96  }
  0x15   :  { %163 = vmatpush.msra.mxu3 %v117_v30  ;;  %v104_v38 = vld [vmem:[%s1096_s3 + $0x20] sm:$0xff]  ;;  %v177_v39 = vld [vmem:[%s1097_s4 + $0x28] sm:$0xff]  ;;  %v103_v40 = vld [vmem:[%s1096_s3 + $0x18] sm:$0xff]  ;;  %630 = vset.pattern.permute.xlu1 %v721_v54  ;;  %s729_s28 = smov 16   ;;  %s730_s29 = smov 48   ;;  %vm514_vm14 = vcmask 392192  }
  0x16   :  { %198 = vmatpush.msrb.mxu0 %v181_v31  ;;  %134 = vmatpush.msra.mxu2 %v107_v32  ;;  %v176_v41 = vld [vmem:[%s1097_s4 + $0x20] sm:$0xff]  ;;  %v102_v42 = vld [vmem:[%s1096_s3 + $0x10] sm:$0xff]  ;;  %v175_v43 = vld [vmem:[%s1097_s4 + $0x18] sm:$0xff]  ;;  %vm517_vm15 = vcmask 523264   ;;  %s731_s10 = smov [#allocation2]   ;;  %s588_s14 = sshll.u32 %s1100_s7, 4  ;;  %s589_s14 = int_to_ptr.hbm [resolvable:$true] %s588_s14 }
  0x17   :  { %v101_v44 = vld [vmem:[%s1096_s3 + $0x8] sm:$0xff]  ;;  %v174_v45 = vld [vmem:[%s1097_s4 + $0x10] sm:$0xff]  ;;  %v100_v47 = vld [vmem:[%s1096_s3] sm:$0xff]  ;;  %628 = vset.pattern.permute.xlu0 %v722_v55  ;;  %633 = vset.pattern.permute.xlu2 %v722_v55  ;;  %s586_s11 = sshll.u32 %s731_s10, 4  ;;  %s732_s16 = smov 128   ;;  %s587_s11 = int_to_ptr.vmem [resolvable:$true] %s586_s11 }
  0x18   :  { %199 = vmatpush.msrb.mxu0 %v180_v33  ;;  %135 = vmatpush.msra.mxu2 %v106_v34  ;;  %v173_v46 = vld [vmem:[%s1097_s4 + $0x8] sm:$0xff]  ;;  %v116_v48 = vld [vmem:[%s1096_s3 + $0x80] sm:$0xff]  ;;  %s733_s17 = smov 8  }
  0x19   :  { %v172_v49 = vld [vmem:[%s1097_s4] sm:$0xff]  ;;  %164 = vmatpush.msra.mxu3 %v116_v48 }
  0x1a   :  { %200 = vmatpush.msrb.mxu0 %v179_v35  ;;  %136 = vmatpush.msra.mxu2 %v105_v36  ;;  %v611_v12 = vld [vmem:[%s1099_s6] sm:$0xf]   ;;  %s726_s6 = smov 32  }
  0x1b   :  { %v612_v13 = vunpack.c.0.s8 %v611_v12  ;;  %v613_v17 = vunpack.c.1.s8 %v611_v12 }
  0x1c   :  { %201 = vmatpush.msrb.mxu0 %v178_v37  ;;  %137 = vmatpush.msra.mxu2 %v104_v38 }
  0x1d   :  { %v947_v16 = vcvt.s32.f32 %v612_v13  ;;  %v954_v27 = vcvt.s32.f32 %v613_v17 }
  0x1e   :  { %202 = vmatpush.msrb.mxu0 %v177_v39  ;;  %138 = vmatpush.msra.mxu2 %v103_v40 }
  0x1f   :  { %vm45_vm1 = vcmp.gt.f32.partialorder %v947_v16, 0.0  ;;  %vm46_vm7 = vcmp.gt.f32.partialorder %v954_v27, 0.0 }
  0x20   :  { %203 = vmatpush.msrb.mxu0 %v176_v41  ;;  %139 = vmatpush.msra.mxu2 %v102_v42 }
  0x22   :  { %204 = vmatpush.msrb.mxu0 %v175_v43  ;;  %140 = vmatpush.msra.mxu2 %v101_v44 }
  0x24   :  { %205 = vmatpush.msrb.mxu0 %v174_v45  ;;  %141 = vmatpush.msra.mxu2 %v100_v47 }
  0x26   :  { %206 = vmatpush.msrb.mxu0 %v173_v46 }
  0x28   :  { %207 = vmatpush.msrb.mxu0 %v172_v49 }
  0x86   :  { %v928_v50 = vpop.f32.mrf.mxu0  ;;  %v94_v51 = vpop.f32.mrf.mxu1 }
  0x87   :  { %142 = vmatmul.f32.vlgmr.msra.gmra.mxu2 %v928_v50  ;;  %604 = vmatmul.msk.f32.vlgmr.msra.gmra.mxu3 %vm47_vm0, %v94_v51 }
  0x88   :  { %208 = vmatmul.f32.vlgmr.msrb.gmra.mxu0 %v928_v50  ;;  %606 = vmatmul.msk.f32.vlgmr.msrb.gmra.mxu1 %vm47_vm0, %v94_v51 }
  0x8e   :  { %v934_v52 = vpop.f32.mrf.mxu0  ;;  %v97_v53 = vpop.f32.mrf.mxu1 }
  0x8f   :  { %553 = vmatpush.msrb.mxu3 %v97_v53  ;;  %145 = vmatmul.f32.gmra.mxu2 %v934_v52 }
  0x90   :  { %211 = vmatmul.f32.gmra.mxu0 %v934_v52  ;;  %607 = vmatmul.msk.f32.gmra.mxu1 %vm47_vm0, %v97_v53 }
  0x91   :  { %554 = vmatpush.msrb.mxu3 %v94_v51 }
  0x92   :  { %605 = vmatmul.msk.f32.gmra.mxu3 %vm47_vm0, %v97_v53 }
 0x105   :  { %v209_v56 = vpop.f32.mrf.mxu0  ;;  %v232_v57 = vpop.f32.mrf.mxu1 }
 0x106   :  { %v233_v58 = vadd.f32 %v232_v57, %v209_v56 }
 0x108   :  { %397 = vperm.xlu1 %630, %v233_v58   ;;  %315 = vperm.xlu0 %628, %v233_v58  }
 0x10a   :  { %v143_v1 = vpop.f32.mrf.mxu2  ;;  %v166_v2 = vpop.f32.mrf.mxu3 }
 0x10b   :  { %v167_v3 = vadd.f32 %v166_v2, %v143_v1 }
 0x10d   :  { %v212_v59 = vpop.f32.mrf.mxu0  ;;  %v235_v60 = vpop.f32.mrf.mxu1 }
 0x10e   :  { %v236_v61 = vadd.f32 %v235_v60, %v212_v59 }
 0x110   :  { %631 = vset.pattern.permute.xlu1 %v723_v62  ;;  %629 = vset.pattern.permute.xlu0 %v724_v63 }
 0x111   :  { %438 = vperm.xlu1 %631, %v233_v58   ;;  %356 = vperm.xlu0 %629, %v233_v58  }
 0x112   :  { %319 = vperm.xlu2 %633, %v236_v61   ;;  %v146_v4 = vpop.f32.mrf.mxu2 }
 0x115   :  { %v169_v5 = vpop.f32.mrf.mxu3 }
 0x116   :  { %v170_v6 = vadd.f32 %v169_v5, %v146_v4 }
 0x119   :  { %632 = vset.pattern.permute.xlu1 %v725_v0 }
 0x11a   :  { %272 = vperm.xlu1 %632, %v233_v58   ;;  %634 = vset.pattern.permute.xlu2 %v724_v63 }
 0x11b   :  { %360 = vperm.xlu2 %634, %v236_v61  }
 0x122   :  { %635 = vset.pattern.permute.xlu1 %v721_v54 }
 0x123   :  { %401 = vperm.xlu1 %635, %v236_v61   ;;  %636 = vset.pattern.permute.xlu2 %v723_v62 }
 0x124   :  { %442 = vperm.xlu2 %636, %v236_v61  }
 0x12b   :  { %637 = vset.pattern.permute.xlu1 %v725_v0  ;;  %v638_v0 = vpack.i.bf16 %v928_v50, %v934_v52 }
 0x12c   :  { %277 = vperm.xlu1 %637, %v236_v61  }
 0x133   :  { %238 = vxpose.xlu0.b32.start [1/2] (short) (narrow) %v167_v3, 8 }
 0x13b   :  { %239 = vxpose.xlu0.b32.end [2/2] (short) (narrow) %v170_v6, 8 }
 0x16c   :  { %v320_v10 = vpop.permute.xlu2 %319 }
 0x175   :  { %v361_v18 = vpop.permute.xlu2 %360 }
 0x17a   :  { %v398_v7 = vpop.permute.xlu1 %397  ;;  %v316_v8 = vpop.permute.xlu0 %315 }
 0x17e   :  { %v443_v45 = vpop.permute.xlu2 %442 }
 0x183   :  { %v439_v9 = vpop.permute.xlu1 %438  ;;  %v357_v11 = vpop.permute.xlu0 %356 }
 0x18c   :  { %v943_v14 = vpop.permute.xlu1 %272 }
 0x195   :  { %v402_v28 = vpop.permute.xlu1 %401 }
 0x1a2   :  { %653 = vset.pattern.permute.xlu0 %v723_v62 }
 0x1d7   :  { %v945_v15 = vpop.trf.xlu0 }
 0x1d8   :  { %v322_v19 = vperm.slane %v945_v15, 1  ;;  %v363_v20 = vperm.slane %v945_v15, 2  ;;  %v404_v21 = vperm.slane %v945_v15, 3  ;;  %v445_v22 = vperm.slane %v945_v15, 4 }
 0x1d9   :  { %v280_v1 = vperm.slane %v945_v15, 0 }
 0x1da   :  { %v364_v23 = vadd.f32 %v363_v20, %v357_v11  ;;  %v323_v24 = vadd.f32 %v322_v19, %v316_v8  ;;  %v405_v25 = vadd.f32 %v404_v21, %v398_v7  ;;  %v446_v26 = vadd.f32 %v445_v22, %v439_v9 }
 0x1db   :  { %v324_v32 = vadd.f32 %v322_v19, %v320_v10  ;;  %v406_v33 = vadd.f32 %v404_v21, %v402_v28  ;;  %v365_v37 = vadd.f32 %v363_v20, %v361_v18  ;;  %v447_v51 = vadd.f32 %v445_v22, %v443_v45  ;;  %v278_v10 = vpop.permute.xlu1 %277 }
 0x1dc   :  { %vm366_vm3 = vcmp.gt.f32.partialorder %v364_v23, 0.0  ;;  %v368_v29 = vmul.f32 0.2, %v364_v23  ;;  %vm325_vm4 = vcmp.gt.f32.partialorder %v323_v24, 0.0  ;;  %v327_v30 = vmul.f32 0.2, %v323_v24 }
 0x1dd   :  { %vm448_vm5 = vcmp.gt.f32.partialorder %v446_v26, 0.0  ;;  %v450_v31 = vmul.f32 0.2, %v446_v26  ;;  %v409_v36 = vmul.f32 0.2, %v405_v25  ;;  %vm407_vm6 = vcmp.gt.f32.partialorder %v405_v25, 0.0 }
 0x1de   :  { %v370_v34 = vsel %vm366_vm3, %v364_v23, %v368_v29  ;;  %v329_v35 = vsel %vm325_vm4, %v323_v24, %v327_v30  ;;  %vm326_vm8 = vcmp.gt.f32.partialorder %v324_v32, 0.0  ;;  %v328_v47 = vmul.f32 0.2, %v324_v32 }
 0x1df   :  { %v452_v38 = vsel %vm448_vm5, %v446_v26, %v450_v31  ;;  %v958_v39 = vsel %vm45_vm1, %v370_v34, -1e+30  ;;  %v962_v40 = vsel %vm45_vm1, %v329_v35, -1e+30  ;;  %v411_v46 = vsel %vm407_vm6, %v405_v25, %v409_v36 }
 0x1e0   :  { %v966_v41 = vsel %vm45_vm1, %v452_v38, -1e+30  ;;  %v374_v42 = vsel %vm291_vm2, %v958_v39, -inf  ;;  %v333_v43 = vsel %vm291_vm2, %v962_v40, -inf  ;;  %vm408_vm9 = vcmp.gt.f32.partialorder %v406_v33, 0.0 }
 0x1e1   :  { %v456_v44 = vsel %vm291_vm2, %v966_v41, -inf  ;;  %375 = vmax.xlane.f32.xlu1 %v374_v42  ;;  %334 = vmax.xlane.f32.xlu2 %v333_v43  ;;  %vm367_vm10 = vcmp.gt.f32.partialorder %v365_v37, 0.0  ;;  %v410_v48 = vmul.f32 0.2, %v406_v33  ;;  %v369_v49 = vmul.f32 0.2, %v365_v37 }
 0x1e2   :  { %457 = vmax.xlane.f32.xlu0 %v456_v44  ;;  %v330_v53 = vsel %vm326_vm8, %v324_v32, %v328_v47  ;;  %v413_v54 = vsel %vm45_vm1, %v411_v46, -1e+30  ;;  %vm449_vm11 = vcmp.gt.f32.partialorder %v447_v51, 0.0  ;;  %v451_v60 = vmul.f32 0.2, %v447_v51 }
 0x1e3   :  { %v979_v55 = vsel %vm46_vm7, %v330_v53, -1e+30  ;;  %v412_v56 = vsel %vm408_vm9, %v406_v33, %v410_v48  ;;  %v371_v57 = vsel %vm367_vm10, %v365_v37, %v369_v49  ;;  %v415_v61 = vsel %vm291_vm2, %v413_v54, -inf }
 0x1e4   :  { %v983_v58 = vsel %vm46_vm7, %v412_v56, -1e+30  ;;  %v987_v59 = vsel %vm46_vm7, %v371_v57, -1e+30  ;;  %v453_v62 = vsel %vm449_vm11, %v447_v51, %v451_v60  ;;  %v281_v2 = vadd.f32 %v280_v1, %v943_v14 }
 0x1e5   :  { %v992_v63 = vsel %vm46_vm7, %v453_v62, -1e+30  ;;  %v336_v7 = vsel %vm291_vm2, %v979_v55, -inf  ;;  %v418_v8 = vsel %vm291_vm2, %v983_v58, -inf  ;;  %v377_v9 = vsel %vm291_vm2, %v987_v59, -inf }
 0x1e6   :  { %v285_v3 = vmul.f32 0.2, %v281_v2  ;;  %vm283_vm12 = vcmp.gt.f32.partialorder %v281_v2, 0.0  ;;  %v282_v11 = vadd.f32 %v280_v1, %v278_v10  ;;  %v459_v13 = vsel %vm291_vm2, %v992_v63, -inf }
 0x1e8   :  { %v287_v4 = vsel %vm283_vm12, %v281_v2, %v285_v3  ;;  %v286_v12 = vmul.f32 0.2, %v282_v11  ;;  %vm284_vm13 = vcmp.gt.f32.partialorder %v282_v11, 0.0 }
 0x1e9   :  { %416 = vmax.xlane.f32.xlu2 %v415_v61  ;;  %v289_v5 = vsel %vm45_vm1, %v287_v4, -1e+30  ;;  %vm540_vm1 = vcmask 654336  }
 0x1ea   :  { %v292_v6 = vsel %vm291_vm2, %v289_v5, -inf  ;;  %v288_v14 = vsel %vm284_vm13, %v282_v11, %v286_v12 }
 0x1eb   :  { %v1013_v15 = vsel %vm46_vm7, %v288_v14, -1e+30 }
 0x1ec   :  { %v295_v16 = vsel %vm291_vm2, %v1013_v15, -inf }
 0x1fa   :  { %639 = vrot.lane.b32.xlu1 %v638_v0, %s726_s6 }
 0x201   :  { %644 = vrot.lane.b32.xlu2 %v638_v0, %s727_s2 }
 0x224   :  { %293 = vmax.xlane.f32.xlu1 %v292_v6 }
 0x22a   :  { %337 = vmax.xlane.f32.xlu2 %v336_v7 }
 0x22c   :  { %419 = vmax.xlane.f32.xlu1 %v418_v8 }
 0x232   :  { %378 = vmax.xlane.f32.xlu2 %v377_v9 }
 0x23a   :  { %460 = vmax.xlane.f32.xlu2 %v459_v13 }
 0x242   :  { %296 = vmax.xlane.f32.xlu2 %v295_v16 }
 0x245   :  { %649 = vrot.lane.b32.xlu1 %v638_v0, %s728_s27 }
 0x254   :  { %v376_v17 = vpop.xlane.xlu1 %375  ;;  %v335_v22 = vpop.xlane.xlu2 %334 }
 0x255   :  { %v458_v18 = vpop.xlane.xlu0 %457  ;;  %v380_v19 = vsub.f32 %v958_v39, %v376_v17  ;;  %v339_v24 = vsub.f32 %v962_v40, %v335_v22 }
 0x256   :  { %v462_v20 = vsub.f32 %v966_v41, %v458_v18 }
 0x257   :  { %v382_v21 = vmul.f32 1.442695, %v380_v19  ;;  %v341_v27 = vmul.f32 1.442695, %v339_v24 }
 0x258   :  { %v464_v23 = vmul.f32 1.442695, %v462_v20 }
 0x259   :  { %655 = vpow2.f32 %v382_v21 }
 0x25a   :  { %657 = vpow2.f32 %v464_v23 }
 0x25b   :  { %659 = vpow2.f32 %v341_v27 }
 0x25c   :  { %v417_v28 = vpop.xlane.xlu2 %416 }
 0x25d   :  { %v421_v30 = vsub.f32 %v413_v54, %v417_v28 }
 0x25f   :  { %v1020_v25 = vpop.eup %655  ;;  %v423_v32 = vmul.f32 1.442695, %v421_v30 }
 0x260   :  { %v386_v26 = vsel %vm291_vm2, %v1020_v25, 0.0  ;;  %v1024_v29 = vpop.eup %657 }
 0x261   :  { %387 = vadd.xlane.f32.xlu2 %v386_v26  ;;  %v468_v31 = vsel %vm291_vm2, %v1024_v29, 0.0  ;;  %v1028_v33 = vpop.eup %659  ;;  %661 = vpow2.f32 %v423_v32 }
 0x262   :  { %v345_v37 = vsel %vm291_vm2, %v1028_v33, 0.0 }
 0x264   :  { %v645_v36 = vpop.permute.xlu2 %644 }
 0x265   :  { %v646_v39 = vunpack.i.l.bf16 %v645_v36  ;;  %v647_v41 = vunpack.i.h.bf16 %v645_v36 }
 0x267   :  { %v1032_v40 = vpop.eup %661 }
 0x268   :  { %v427_v42 = vsel %vm291_vm2, %v1032_v40, 0.0 }
 0x269   :  { %469 = vadd.xlane.f32.xlu2 %v468_v31 }
 0x26c   :  { %v640_v34 = vpop.permute.xlu1 %639 }
 0x26d   :  { %v641_v35 = vunpack.i.l.bf16 %v640_v34  ;;  %v642_v38 = vunpack.i.h.bf16 %v640_v34 }
 0x26f   :  { %555 = vmatpush.msrb.mxu3 %v641_v35  ;;  %346 = vadd.xlane.f32.xlu1 %v345_v37 }
 0x271   :  { %556 = vmatpush.msrb.mxu3 %v642_v38 }
 0x273   :  { %557 = vmatpush.msrb.mxu3 %v646_v39 }
 0x275   :  { %558 = vmatpush.msrb.mxu3 %v647_v41 }
 0x277   :  { %428 = vadd.xlane.f32.xlu1 %v427_v42 }
 0x297   :  { %v294_v43 = vpop.xlane.xlu1 %293 }
 0x298   :  { %v298_v44 = vsub.f32 %v289_v5, %v294_v43 }
 0x29a   :  { %v300_v45 = vmul.f32 1.442695, %v298_v44 }
 0x29c   :  { %663 = vpow2.f32 %v300_v45 }
 0x29d   :  { %v338_v46 = vpop.xlane.xlu2 %337 }
 0x29e   :  { %v340_v47 = vsub.f32 %v979_v55, %v338_v46 }
 0x29f   :  { %v420_v48 = vpop.xlane.xlu1 %419 }
 0x2a0   :  { %v343_v49 = vmul.f32 1.442695, %v340_v47  ;;  %v422_v51 = vsub.f32 %v983_v58, %v420_v48 }
 0x2a2   :  { %v1038_v53 = vpop.eup %663  ;;  %665 = vpow2.f32 %v343_v49  ;;  %v425_v56 = vmul.f32 1.442695, %v422_v51 }
 0x2a3   :  { %v304_v54 = vsel %vm291_vm2, %v1038_v53, 0.0 }
 0x2a4   :  { %305 = vadd.xlane.f32.xlu2 %v304_v54  ;;  %667 = vpow2.f32 %v425_v56 }
 0x2a5   :  { %v379_v57 = vpop.xlane.xlu2 %378 }
 0x2a6   :  { %v381_v60 = vsub.f32 %v987_v59, %v379_v57 }
 0x2a8   :  { %v666_v61 = vpop.eup %665  ;;  %v384_v62 = vmul.f32 1.442695, %v381_v60 }
 0x2a9   :  { %v348_v55 = vsel %vm291_vm2, %v666_v61, 0.0 }
 0x2aa   :  { %669 = vpow2.f32 %v384_v62  ;;  %349 = vadd.xlane.f32.xlu1 %v348_v55  ;;  %v1044_v58 = vpop.eup %667  ;;  %v654_v55 = vld [vmem:[%s1098_s5] ss:$0 sm:$0xff] }
 0x2ab   :  { %v430_v5 = vsel %vm291_vm2, %v1044_v58, 0.0 }
 0x2ad   :  { %v461_v0 = vpop.xlane.xlu2 %460 }
 0x2ae   :  { %v463_v1 = vsub.f32 %v992_v63, %v461_v0 }
 0x2b0   :  { %v670_v2 = vpop.eup %669  ;;  %v466_v3 = vmul.f32 1.442695, %v463_v1  ;;  %v29_v1 = vld [vmem:[%s1094_s1] sm:$0xff] }
 0x2b1   :  { %v389_v4 = vsel %vm291_vm2, %v670_v2, 0.0 }
 0x2b2   :  { %671 = vpow2.f32 %v466_v3  ;;  %390 = vadd.xlane.f32.xlu2 %v389_v4  ;;  %431 = vadd.xlane.f32.xlu1 %v430_v5 }
 0x2b5   :  { %v297_v59 = vpop.xlane.xlu2 %296 }
 0x2b6   :  { %v299_v6 = vsub.f32 %v1013_v15, %v297_v59  ;;  %v30_v59 = vld [vmem:[%s1094_s1 + $0x8] sm:$0xff] }
 0x2b7   :  { %v650_v7 = vpop.permute.xlu1 %649 }
 0x2b8   :  { %v672_v8 = vpop.eup %671  ;;  %v302_v9 = vmul.f32 1.442695, %v299_v6  ;;  %v651_v10 = vunpack.i.l.bf16 %v650_v7  ;;  %v652_v63 = vunpack.i.h.bf16 %v650_v7 }
 0x2b9   :  { %v471_v11 = vsel %vm291_vm2, %v672_v8, 0.0 }
 0x2ba   :  { %673 = vpow2.f32 %v302_v9  ;;  %472 = vadd.xlane.f32.xlu2 %v471_v11  ;;  %559 = vmatpush.msrb.mxu3 %v651_v10 }
 0x2bc   :  { %560 = vmatpush.msrb.mxu3 %v652_v63 }
 0x2be   :  { %561 = vmatpush.msrb.mxu3 %v934_v52 }
 0x2c0   :  { %v1053_v12 = vpop.eup %673  ;;  %562 = vmatpush.msrb.mxu3 %v928_v50 }
 0x2c1   :  { %v307_v13 = vsel %vm291_vm2, %v1053_v12, 0.0 }
 0x2c2   :  { %308 = vadd.xlane.f32.xlu1 %v307_v13 }
 0x2d4   :  { %v388_v15 = vpop.xlane.xlu2 %387 }
 0x2dc   :  { %v470_v52 = vpop.xlane.xlu2 %469 }
 0x2e2   :  { %v347_v14 = vpop.xlane.xlu1 %346 }
 0x2e3   :  { %675 = vrcp.f32 %v347_v14 }
 0x2e4   :  { %677 = vrcp.f32 %v388_v15 }
 0x2e9   :  { %v676_v16 = vpop.eup %675 }
 0x2ea   :  { %v429_v17 = vpop.xlane.xlu1 %428  ;;  %v353_v18 = vmul.f32 %v676_v16, %v1028_v33  ;;  %v678_v19 = vpop.eup %677 }
 0x2eb   :  { %679 = vrcp.f32 %v429_v17  ;;  %v394_v50 = vmul.f32 %v678_v19, %v1020_v25 }
 0x2ec   :  { %480 = vrot.lane.b32.xlu2 %v353_v18, %s729_s28  ;;  %681 = vrcp.f32 %v470_v52 }
 0x2f1   :  { %v680_v20 = vpop.eup %679 }
 0x2f2   :  { %v435_v21 = vmul.f32 %v680_v20, %v1032_v40  ;;  %v682_v22 = vpop.eup %681 }
 0x2f3   :  { %v476_v23 = vmul.f32 %v682_v22, %v1024_v29 }
 0x2f4   :  { %488 = vrot.lane.b32.xlu2 %v394_v50, %s726_s6  ;;  %496 = vrot.lane.b32.xlu0 %v435_v21, %s730_s29 }
 0x2fc   :  { %504 = vrot.lane.b32.xlu2 %v476_v23, %s727_s2 }
 0x317   :  { %v306_v24 = vpop.xlane.xlu2 %305 }
 0x31d   :  { %v350_v26 = vpop.xlane.xlu1 %349 }
 0x31e   :  { %683 = vrcp.f32 %v350_v26 }
 0x324   :  { %v684_v27 = vpop.eup %683 }
 0x325   :  { %v391_v28 = vpop.xlane.xlu2 %390  ;;  %v432_v30 = vpop.xlane.xlu1 %431  ;;  %v354_v31 = vmul.f32 %v684_v27, %v666_v61 }
 0x326   :  { %685 = vrcp.f32 %v391_v28 }
 0x327   :  { %687 = vrcp.f32 %v432_v30  ;;  %482 = vrot.lane.b32.xlu2 %v354_v31, %s729_s28 }
 0x32c   :  { %v686_v25 = vpop.eup %685 }
 0x32d   :  { %v688_v32 = vpop.eup %687  ;;  %v473_v33 = vpop.xlane.xlu2 %472  ;;  %v395_v34 = vmul.f32 %v686_v25, %v670_v2 }
 0x32e   :  { %689 = vrcp.f32 %v473_v33  ;;  %v436_v35 = vmul.f32 %v688_v32, %v1044_v58 }
 0x32f   :  { %490 = vrot.lane.b32.xlu0 %v395_v34, %s726_s6  ;;  %691 = vrcp.f32 %v306_v24 }
 0x330   :  { %498 = vrot.lane.b32.xlu2 %v436_v35, %s730_s29 }
 0x334   :  { %v690_v29 = vpop.eup %689 }
 0x335   :  { %v477_v36 = vmul.f32 %v690_v29, %v672_v8  ;;  %v692_v39 = vpop.eup %691  ;;  %v309_v47 = vpop.xlane.xlu1 %308 }
 0x336   :  { %v312_v40 = vmul.f32 %v692_v39, %v1038_v53  ;;  %693 = vrcp.f32 %v309_v47 }
 0x337   :  { %506 = vrot.lane.b32.xlu1 %v477_v36, %s727_s2 }
 0x33c   :  { %v694_v49 = vpop.eup %693 }
 0x33d   :  { %v313_v51 = vmul.f32 %v694_v49, %v1053_v12 }
 0x346   :  { %v481_v37 = vpop.permute.xlu2 %480 }
 0x347   :  { %v510_v41 = vsel %vm291_vm2, %v312_v40, %v481_v37 }
 0x34e   :  { %v489_v38 = vpop.permute.xlu2 %488 }
 0x34f   :  { %v512_v42 = vsel %vm47_vm0, %v510_v41, %v489_v38 }
 0x356   :  { %v505_v44 = vpop.permute.xlu2 %504 }
 0x366   :  { %v497_v43 = vpop.permute.xlu0 %496 }
 0x367   :  { %v515_v45 = vsel %vm514_vm14, %v512_v42, %v497_v43 }
 0x368   :  { %v518_v46 = vsel %vm517_vm15, %v515_v45, %v505_v44 }
 0x369   :  { %608 = vmatmul.msk.f32.vlgmr.msrb.gmra.mxu3 %vm540_vm1, %v518_v46 }
 0x381   :  { %v483_v48 = vpop.permute.xlu2 %482 }
 0x382   :  { %v511_v54 = vsel %vm291_vm2, %v313_v51, %v483_v48 }
 0x38a   :  { %v499_v57 = vpop.permute.xlu2 %498 }
 0x3a1   :  { %v491_v53 = vpop.permute.xlu0 %490 }
 0x3a2   :  { %v513_v56 = vsel %vm47_vm0, %v511_v54, %v491_v53 }
 0x3a3   :  { %v516_v61 = vsel %vm514_vm14, %v513_v56, %v499_v57 }
 0x3a9   :  { %v507_v60 = vpop.permute.xlu1 %506 }
 0x3aa   :  { %v519_v62 = vsel %vm517_vm15, %v516_v61, %v507_v60 }
 0x3ab   :  { %609 = vmatmul.msk.f32.gmra.mxu3 %vm540_vm1, %v519_v62 }
 0x3ec   :  { %v564_v0 = vpop.f32.mrf.mxu3 }
 0x3ed   :  { %v570_v58 = vmul.f32 0.2, %v564_v0 }
 0x3ef   :  { %v576_v2 = vadd.f32 %v654_v55, %v570_v58 }
 0x3f1   :  { %v578_v3 = vadd.f32 %v576_v2, %v29_v1 }
 0x3f3   :  { %580 = vst.msk [vmem:[#allocation2] sm:$0xff] %vm47_vm0, %v578_v3 }
 0x42e   :  { %v567_v4 = vpop.f32.mrf.mxu3 }
 0x42f   :  { %v571_v5 = vmul.f32 0.2, %v567_v4 }
 0x431   :  { %v577_v6 = vadd.f32 %v654_v55, %v571_v5 }
 0x433   :  { %v579_v7 = vadd.f32 %v577_v6, %v30_v59 }
 0x435   :  { %581 = vst.msk [vmem:[#allocation2 + $0x8] sm:$0xff] %vm47_vm0, %v579_v7 }
 0x436   :  { %594 = dma.vmem_to_hbm [thread:$0]  %s587_s11, 256, %s589_s14, [#allocation3], %s732_s16, %s732_s16, %s733_s17  }
 0x437   :  { %719 = dma.done.wait [#allocation3], 256  }
 0x438   :  { %720 = vsyncadd [#allocation3], 4294967040 }
 0x439   :  { %599 = vsyncpa [#allocation3], 1 }

</bundles_post_ra>
